<compile_context>
chip_gen: v6e
topology: v6e:2x2x1
jax: 0.10.0
libtpu: 0.0.40
codegen_flags: <defaults>
</compile_context>

<pallas_src>
import jax
import jax.numpy as jnp
from jax.experimental import pallas as pl
from jax.experimental.pallas import tpu as pltpu

C_COND = 32   # condition channels
C_MID = 32    # hidden channels of the 1x1 conv stacks
C_OUT = 64    # feature / output channels


def _cft_kernel(feat_ref, cond_ref, w1_ref, b1_ref,
                w2s_ref, b2s_ref, w2t_ref, b2t_ref, out_ref):
    """One tile of pixels (lanes): fused first layer, split second layer, FiLM.

    feat_ref: (1, 64, T)            cond_ref: (1, 32, T)
    w1_ref:   (64, 32) bf16         b1_ref:   (64, 1) f32   -- [scale ; shift] L1 stacked
    w2s_ref:  (64, 32) bf16         b2s_ref:  (64, 1) f32   -- scale L2, bias has +1 folded in
    w2t_ref:  (64, 32) bf16         b2t_ref:  (64, 1) f32   -- shift L2
    out_ref:  (1, 64, T)
    """
    cond = cond_ref[0]                                   # (32, T)

    # Fused first layer of both branches: (64,32) @ (32,T) -> (64,T), bf16 MXU, f32 acc.
    h = jnp.dot(w1_ref[...], cond.astype(jnp.bfloat16),
                preferred_element_type=jnp.float32) + b1_ref[...]
    h = jnp.maximum(h, 0.1 * h)                          # LeakyReLU(0.1)
    h_b = h.astype(jnp.bfloat16)                         # (64, T) bf16 for the MXU

    # Second layers, consumed immediately (peak temp = one (64,T) f32 buffer each).
    # Rows 0:32 of h feed the scale branch, rows 32:64 feed the shift branch.
    scale_p1 = jnp.dot(w2s_ref[...], h_b[:C_MID],
                       preferred_element_type=jnp.float32) + b2s_ref[...]  # scale + 1
    shift = jnp.dot(w2t_ref[...], h_b[C_MID:],
                    preferred_element_type=jnp.float32) + b2t_ref[...]

    feat = feat_ref[0]                                   # (64, T), promotes lazily
    out_ref[0] = (feat * scale_p1 + shift).astype(out_ref.dtype)


def cft_layer(feature_nchw, condition_nchw, params, *, tile_hw=8192):
    """feature: (N, 64, H, W), condition: (N, 32, H, W) -> (N, 64, H, W)."""
    N, Cf, H, W = feature_nchw.shape
    Nc, Cc, Hc, Wc = condition_nchw.shape
    assert Cf == C_OUT and Cc == C_COND and (N, H, W) == (Nc, Hc, Wc)
    HW = H * W

    (w1s, b1s, w2s, b2s, w1t, b1t, w2t, b2t) = params

    # --- pack / fuse the tiny weights once, outside the kernel ----------------
    # First layers of both branches stacked on the output dim: (64, 32) bf16.
    w1_cat = jnp.concatenate([w1s, w1t], axis=0).astype(jnp.bfloat16)
    b1_cat = jnp.concatenate([b1s, b1t], axis=0).reshape(2 * C_MID, 1).astype(jnp.float32)
    # Second layers kept separate (64, 32) bf16; the FiLM "+1" is folded into b2 of
    # the scale branch so the kernel computes feat * scale_p1 + shift directly.
    w2s_b = w2s.astype(jnp.bfloat16)
    b2s_p1 = (b2s.astype(jnp.float32) + 1.0).reshape(C_OUT, 1)
    w2t_b = w2t.astype(jnp.bfloat16)
    b2t_f = b2t.astype(jnp.float32).reshape(C_OUT, 1)

    # --- NCHW-native flatten: (N, C, H, W) -> (N, C, H*W), contiguous / free ---
    feat = feature_nchw.reshape(N, C_OUT, HW)
    cond = condition_nchw.reshape(N, C_COND, HW)

    # Pixel tile on the lane dim: as large as practical, multiple of 128 unless full.
    tile = min(tile_hw, HW)
    if tile < HW:
        tile = max(128, (tile // 128) * 128)
    # Megacore (v7x has 2 TCs/chip): make sure the grid has >= 2 steps when possible.
    if N * pl.cdiv(HW, tile) < 2 and HW >= 256:
        tile = max(128, ((pl.cdiv(HW, 2) + 127) // 128) * 128)
    grid = (N, pl.cdiv(HW, tile))

    px_spec = lambda c: pl.BlockSpec((1, c, tile), lambda n, i: (n, 0, i))
    full_spec = lambda shape: pl.BlockSpec(shape, lambda n, i: (0, 0))

    out = pl.pallas_call(
        _cft_kernel,
        out_shape=jax.ShapeDtypeStruct((N, C_OUT, HW), feature_nchw.dtype),
        grid_spec=pltpu.PrefetchScalarGridSpec(
            num_scalar_prefetch=0,
            grid=grid,
            in_specs=[
                px_spec(C_OUT),                     # feature tile   (1, 64, T)
                px_spec(C_COND),                    # condition tile (1, 32, T)
                full_spec((2 * C_MID, C_COND)),     # fused W1 (64, 32) bf16
                full_spec((2 * C_MID, 1)),          # fused b1 (64, 1)
                full_spec((C_OUT, C_MID)),          # W2 scale (64, 32) bf16
                full_spec((C_OUT, 1)),              # b2 scale + 1 (64, 1)
                full_spec((C_OUT, C_MID)),          # W2 shift (64, 32) bf16
                full_spec((C_OUT, 1)),              # b2 shift (64, 1)
            ],
            out_specs=px_spec(C_OUT),
        ),
        compiler_params=pltpu.CompilerParams(
            dimension_semantics=("parallel", "parallel"),
            vmem_limit_bytes=48 << 20),
    )(feat, cond, w1_cat, b1_cat, w2s_b, b2s_p1, w2t_b, b2t_f)

    return out.reshape(N, C_OUT, H, W)


def init_params(key):
    """Deterministic synthetic weights matching the Conv2d(1x1) shapes.

    Conv2d(Cin,Cout,1,1).weight squeezed to (Cout, Cin); biases as (Cout,).
    Kernel applies W @ x (channels-first), matching conv semantics directly.
    """
    ks = jax.random.split(key, 8)

    def u(k, shape, fan_in):
        bound = 1.0 / jnp.sqrt(fan_in)
        return jax.random.uniform(k, shape, jnp.float32, -bound, bound)

    w1s = u(ks[0], (C_MID, C_COND), C_COND)
    b1s = u(ks[1], (C_MID,), C_COND)
    w2s = u(ks[2], (C_OUT, C_MID), C_MID)
    b2s = u(ks[3], (C_OUT,), C_MID)
    w1t = u(ks[4], (C_MID, C_COND), C_COND)
    b1t = u(ks[5], (C_MID,), C_COND)
    w2t = u(ks[6], (C_OUT, C_MID), C_MID)
    b2t = u(ks[7], (C_OUT,), C_MID)
    return (w1s, b1s, w2s, b2s, w1t, b1t, w2t, b2t)


def cft_layer_ref(feature, condition, params):
    """Plain-JAX f32 reference (NCHW), mirrors the PyTorch forward."""
    (w1s, b1s, w2s, b2s, w1t, b1t, w2t, b2t) = params

    def branch(w1, b1, w2, b2):
        h = jnp.einsum('oi,nihw->nohw', w1, condition) + b1[None, :, None, None]
        h = jnp.where(h > 0, h, 0.1 * h)
        return jnp.einsum('oi,nihw->nohw', w2, h) + b2[None, :, None, None]

    scale = branch(w1s, b1s, w2s, b2s)
    shift = branch(w1t, b1t, w2t, b2t)
    return feature * (scale + 1.0) + shift


if __name__ == "__main__":
    key = jax.random.PRNGKey(0)
    k_feat, k_cond, k_par = jax.random.split(key, 3)

    N, H, W = 2, 16, 16
    feature = jax.random.normal(k_feat, (N, C_OUT, H, W), jnp.float32)
    condition = jax.random.normal(k_cond, (N, C_COND, H, W), jnp.float32)
    params = init_params(k_par)

    out = cft_layer(feature, condition, params)
    out = jax.block_until_ready(out)

    ref = cft_layer_ref(feature, condition, params)
    assert out.shape == (N, C_OUT, H, W)
    # bf16 MXU operands vs f32 reference: tolerance loosened accordingly.
    assert jnp.allclose(out, ref, atol=1e-1, rtol=1e-2), "mismatch vs JAX reference"

    print("KERNEL_OK")
</pallas_src>

<mosaic_0001>
module attributes {stable_mosaic.version = 11 : i64} {
  func.func @_cft_kernel(%arg0: i32, %arg1: i32, %arg2: memref<1x64x256xf32, #tpu.memory_space<vmem>>, %arg3: memref<1x32x256xf32, #tpu.memory_space<vmem>>, %arg4: memref<64x32xbf16, #tpu.memory_space<vmem>>, %arg5: memref<64x1xf32, #tpu.memory_space<vmem>>, %arg6: memref<64x32xbf16, #tpu.memory_space<vmem>>, %arg7: memref<64x1xf32, #tpu.memory_space<vmem>>, %arg8: memref<64x32xbf16, #tpu.memory_space<vmem>>, %arg9: memref<64x1xf32, #tpu.memory_space<vmem>>, %arg10: memref<1x64x256xf32, #tpu.memory_space<vmem>>) attributes {dimension_semantics = [#tpu.dimension_semantics<parallel>, #tpu.dimension_semantics<parallel>], iteration_bounds = array<i64: 2, 1>, scalar_prefetch = 0 : i64, scratch_operands = 0 : i64, tpu.core_type = #tpu.core_type<tc>, window_params = [{transform_indices = @transform_0, window_bounds = array<i64: 1, 64, 256>}, {transform_indices = @transform_1, window_bounds = array<i64: 1, 32, 256>}, {pipeline_mode = #tpu.pipeline_mode<synchronous>, transform_indices = @transform_2, window_bounds = array<i64: 64, 32>}, {pipeline_mode = #tpu.pipeline_mode<synchronous>, transform_indices = @transform_3, window_bounds = array<i64: 64, 1>}, {pipeline_mode = #tpu.pipeline_mode<synchronous>, transform_indices = @transform_4, window_bounds = array<i64: 64, 32>}, {pipeline_mode = #tpu.pipeline_mode<synchronous>, transform_indices = @transform_5, window_bounds = array<i64: 64, 1>}, {pipeline_mode = #tpu.pipeline_mode<synchronous>, transform_indices = @transform_6, window_bounds = array<i64: 64, 32>}, {pipeline_mode = #tpu.pipeline_mode<synchronous>, transform_indices = @transform_7, window_bounds = array<i64: 64, 1>}, {transform_indices = @transform_8, window_bounds = array<i64: 1, 64, 256>}]} {
    %c0 = arith.constant 0 : index
    %c0_0 = arith.constant 0 : index
    %c0_1 = arith.constant 0 : index
    %0 = vector.load %arg3[%c0, %c0_0, %c0_1] : memref<1x32x256xf32, #tpu.memory_space<vmem>>, vector<1x32x256xf32>
    %1 = vector.shape_cast %0 : vector<1x32x256xf32> to vector<32x256xf32>
    %c0_2 = arith.constant 0 : index
    %c0_3 = arith.constant 0 : index
    %2 = vector.load %arg4[%c0_2, %c0_3] : memref<64x32xbf16, #tpu.memory_space<vmem>>, vector<64x32xbf16>
    %3 = arith.truncf %1 : vector<32x256xf32> to vector<32x256xbf16>
    %cst = arith.constant dense<0.000000e+00> : vector<64x256xf32>
    %4 = tpu.matmul %2, %3, %cst {dimension_numbers = #tpu.dot_dimension_numbers<[1], [0], [0], [1], [0, 0, 1, 1], [], []>} : vector<64x32xbf16>, vector<32x256xbf16>, vector<64x256xf32> -> vector<64x256xf32>
    %c0_4 = arith.constant 0 : index
    %c0_5 = arith.constant 0 : index
    %5 = vector.load %arg5[%c0_4, %c0_5] : memref<64x1xf32, #tpu.memory_space<vmem>>, vector<64x1xf32>
    %6 = vector.broadcast %5 : vector<64x1xf32> to vector<64x256xf32>
    %7 = arith.addf %4, %6 : vector<64x256xf32>
    %cst_6 = arith.constant 1.000000e-01 : f32
    %8 = vector.broadcast %cst_6 : f32 to vector<64x256xf32>
    %9 = arith.mulf %8, %7 : vector<64x256xf32>
    %10 = arith.maximumf %7, %9 : vector<64x256xf32>
    %11 = arith.truncf %10 : vector<64x256xf32> to vector<64x256xbf16>
    %c0_7 = arith.constant 0 : index
    %c0_8 = arith.constant 0 : index
    %12 = vector.load %arg6[%c0_7, %c0_8] : memref<64x32xbf16, #tpu.memory_space<vmem>>, vector<64x32xbf16>
    %13 = vector.extract_strided_slice %11 {offsets = [0, 0], sizes = [32, 256], strides = [1, 1]} : vector<64x256xbf16> to vector<32x256xbf16>
    %cst_9 = arith.constant dense<0.000000e+00> : vector<64x256xf32>
    %14 = tpu.matmul %12, %13, %cst_9 {dimension_numbers = #tpu.dot_dimension_numbers<[1], [0], [0], [1], [0, 0, 1, 1], [], []>} : vector<64x32xbf16>, vector<32x256xbf16>, vector<64x256xf32> -> vector<64x256xf32>
    %c0_10 = arith.constant 0 : index
    %c0_11 = arith.constant 0 : index
    %15 = vector.load %arg7[%c0_10, %c0_11] : memref<64x1xf32, #tpu.memory_space<vmem>>, vector<64x1xf32>
    %16 = vector.broadcast %15 : vector<64x1xf32> to vector<64x256xf32>
    %17 = arith.addf %14, %16 : vector<64x256xf32>
    %c0_12 = arith.constant 0 : index
    %c0_13 = arith.constant 0 : index
    %18 = vector.load %arg8[%c0_12, %c0_13] : memref<64x32xbf16, #tpu.memory_space<vmem>>, vector<64x32xbf16>
    %19 = vector.extract_strided_slice %11 {offsets = [32, 0], sizes = [32, 256], strides = [1, 1]} : vector<64x256xbf16> to vector<32x256xbf16>
    %cst_14 = arith.constant dense<0.000000e+00> : vector<64x256xf32>
    %20 = tpu.matmul %18, %19, %cst_14 {dimension_numbers = #tpu.dot_dimension_numbers<[1], [0], [0], [1], [0, 0, 1, 1], [], []>} : vector<64x32xbf16>, vector<32x256xbf16>, vector<64x256xf32> -> vector<64x256xf32>
    %c0_15 = arith.constant 0 : index
    %c0_16 = arith.constant 0 : index
    %21 = vector.load %arg9[%c0_15, %c0_16] : memref<64x1xf32, #tpu.memory_space<vmem>>, vector<64x1xf32>
    %22 = vector.broadcast %21 : vector<64x1xf32> to vector<64x256xf32>
    %23 = arith.addf %20, %22 : vector<64x256xf32>
    %c0_17 = arith.constant 0 : index
    %c0_18 = arith.constant 0 : index
    %c0_19 = arith.constant 0 : index
    %24 = vector.load %arg2[%c0_17, %c0_18, %c0_19] : memref<1x64x256xf32, #tpu.memory_space<vmem>>, vector<1x64x256xf32>
    %25 = vector.shape_cast %24 : vector<1x64x256xf32> to vector<64x256xf32>
    %26 = arith.mulf %25, %17 : vector<64x256xf32>
    %27 = arith.addf %26, %23 : vector<64x256xf32>
    %c0_20 = arith.constant 0 : index
    %c0_21 = arith.constant 0 : index
    %c0_22 = arith.constant 0 : index
    %28 = vector.load %arg10[%c0_20, %c0_21, %c0_22] : memref<1x64x256xf32, #tpu.memory_space<vmem>>, vector<1x64x256xf32>
    %29 = vector.shape_cast %28 : vector<1x64x256xf32> to vector<64x256xf32>
    %30 = vector.shape_cast %27 : vector<64x256xf32> to vector<1x64x256xf32>
    tpu.vector_store %arg10[%c0_20, %c0_21, %c0_22], %30 {strides = array<i32>} : memref<1x64x256xf32, #tpu.memory_space<vmem>>, vector<1x64x256xf32>,
    return
  }
  func.func @transform_0(%arg0: i32, %arg1: i32) -> (i32, i32, i32) {
    %c0_i32 = arith.constant 0 : i32
    %c0_i32_0 = arith.constant 0 : i32
    return %arg0, %c0_i32, %arg1 : i32, i32, i32
  }
  func.func @transform_1(%arg0: i32, %arg1: i32) -> (i32, i32, i32) {
    %c0_i32 = arith.constant 0 : i32
    %c0_i32_0 = arith.constant 0 : i32
    return %arg0, %c0_i32, %arg1 : i32, i32, i32
  }
  func.func @transform_2(%arg0: i32, %arg1: i32) -> (i32, i32) {
    %c0_i32 = arith.constant 0 : i32
    %c0_i32_0 = arith.constant 0 : i32
    %c0_i32_1 = arith.constant 0 : i32
    return %c0_i32, %c0_i32_0 : i32, i32
  }
  func.func @transform_3(%arg0: i32, %arg1: i32) -> (i32, i32) {
    %c0_i32 = arith.constant 0 : i32
    %c0_i32_0 = arith.constant 0 : i32
    %c0_i32_1 = arith.constant 0 : i32
    return %c0_i32, %c0_i32_0 : i32, i32
  }
  func.func @transform_4(%arg0: i32, %arg1: i32) -> (i32, i32) {
    %c0_i32 = arith.constant 0 : i32
    %c0_i32_0 = arith.constant 0 : i32
    %c0_i32_1 = arith.constant 0 : i32
    return %c0_i32, %c0_i32_0 : i32, i32
  }
  func.func @transform_5(%arg0: i32, %arg1: i32) -> (i32, i32) {
    %c0_i32 = arith.constant 0 : i32
    %c0_i32_0 = arith.constant 0 : i32
    %c0_i32_1 = arith.constant 0 : i32
    return %c0_i32, %c0_i32_0 : i32, i32
  }
  func.func @transform_6(%arg0: i32, %arg1: i32) -> (i32, i32) {
    %c0_i32 = arith.constant 0 : i32
    %c0_i32_0 = arith.constant 0 : i32
    %c0_i32_1 = arith.constant 0 : i32
    return %c0_i32, %c0_i32_0 : i32, i32
  }
  func.func @transform_7(%arg0: i32, %arg1: i32) -> (i32, i32) {
    %c0_i32 = arith.constant 0 : i32
    %c0_i32_0 = arith.constant 0 : i32
    %c0_i32_1 = arith.constant 0 : i32
    return %c0_i32, %c0_i32_0 : i32, i32
  }
  func.func @transform_8(%arg0: i32, %arg1: i32) -> (i32, i32, i32) {
    %c0_i32 = arith.constant 0 : i32
    %c0_i32_0 = arith.constant 0 : i32
    return %arg0, %c0_i32, %arg1 : i32, i32, i32
  }
}

</mosaic_0001>

<bundles_post_ra>
// kernel: tpu_custom_call.1
= control target key start
LH: loop header
LB: loop body
LE: loop exit
PB: predicated region body
PF: predicated region fallthrough
CT: control target
= control target key end

     0   :  { %13 = vsyncpa [#allocation3], 0  ;;  %s1736_s0 = inlined_call_operand.vmem [shape: f32[2,64,256], index: 0, kind: input, shape index: {}]   ;;  %s1737_s1 = inlined_call_operand.hbm [shape: f32[2,32,256], index: 1, kind: input, shape index: {}]   ;;  %s1738_s2 = inlined_call_operand.vmem [shape: bf16[64,32], index: 2, kind: input, shape index: {}]   ;;  %s1739_s3 = inlined_call_operand.vmem [shape: f32[64,1], index: 3, kind: input, shape index: {}]   ;;  %s1740_s4 = inlined_call_operand.vmem [shape: bf16[64,32], index: 4, kind: input, shape index: {}]   ;;  %s1741_s5 = inlined_call_operand.vmem [shape: f32[64,1], index: 5, kind: input, shape index: {}]   ;;  %s1742_s6 = inlined_call_operand.vmem [shape: bf16[64,32], index: 6, kind: input, shape index: {}]   ;;  %s1743_s7 = inlined_call_operand.vmem [shape: f32[64,1], index: 7, kind: input, shape index: {}]   ;;  %s1744_s8 = inlined_call_operand.hbm [shape: f32[2,64,256], index: 8, kind: output, shape index: {}]  }
   0x1   :  { %15 = vsyncpa [#allocation3 + $0x1], 0 }
   0x2   :  { %16 = vsyncpa [#allocation4], 0 }
   0x3   :  { %18 = vsyncpa [#allocation4 + $0x1], 0  ;;  %s1393_s27 = smov 0   ;;  %s1395_s28 = smov 0  }
   0x4   :  { %s1397_s29 = smov 0   ;;  %s1399_s30 = smov 0  }
   0x5   :  { %s1401_s9 = smov 0   ;;  %s1403_s10 = smov 0  }
   0x6 LB: > { %1747 = sst [smem:[#allocation8_spill]] %s1335_s9  ;;  %s1102_s11 = sadd.s32 4294967295, %s1339_s10   ;;  %s1339_s10 = sphi %s1403_s10, %s24_s10   ;;  %s1335_s9 = sphi %s1401_s9, %s1756_s9   ;;  %s1331_s30 = sphi %s1399_s30, %s1755_s30   ;;  %s1327_s29 = sphi %s1397_s29, %s1759_s29   ;;  %s1323_s28 = sphi %s1395_s28, %s1758_s28   ;;  %s1319_s27 = sphi %s1393_s27, %s1757_s27  }
   0x7   : > { %s1103_s12 = sadd.s32 4294967294, %s1339_s10   ;;  %s36_s13 = sadd.s32 1, %s1335_s9 }
   0x8   : > { %s73_s14 = sadd.s32 1, %s1327_s29  ;;  %p38_p0 = scmp.ge.s32.totalorder %s36_s13, 2 }
   0x9   : > { %p80_p1 = scmp.ne.s32.totalorder %s1327_s29, %s1323_s28  ;;  %p81_p2 = scmp.eq.s32.totalorder %s1339_s10, 0 }
   0xa   : > { %p86_p3 = scmp.ne.s32.totalorder %s1323_s28, %s1319_s27  ;;  %s1761_s13 = smov (%p38_p0, %s36_s13), 0 }
   0xb   : > { %1748 = sst [smem:[#allocation9_spill]] %s1761_s13  ;;  %p1434_p4 = por %p81_p2, %p80_p1 }
   0xc   : > { %p87_p5 = scmp.eq.s32.totalorder %s1102_s11, 0  ;;  %s68_s16 = ssub.s32 %s1335_s9, %s1761_s13 }
   0xd   : > { %p238_p6 = scmp.eq.s32.totalorder %s1102_s11, 1  ;;  %p71_p7 = scmp.eq.s32.totalorder %s68_s16, 0 }
   0xe   : > { %p1440_p8 = por %p87_p5, %p86_p3  ;;  %p244_p10 = scmp.eq.s32.totalorder %s1103_s12, 1 }
   0xf   : > { %p1444_p9 = por %p238_p6, %p80_p1  ;;  %p1162_p13 = scmp.lt.s32.totalorder %s1339_s10, 2 }
  0x10   : > { %s1449_s19 = scalar_select %p71_p7, %s1327_s29, %s73_s14  }
  0x11   : > { %p1451_p11 = por %p244_p10, %p86_p3  ;;  %s295_s21 = sand.u32 1, %s1327_s29  }
  0x12   : > { %s1106_s22 = sshll.u32 %s295_s21, 6  ;;  %s1143_s23 = sshll.u32 %s1335_s9, 10 }
  0x13   : > { %s307_s26 = scalar_lea.hbm %s1737_s1, %s1143_s23  ;;  %s299_s11 = scalar_lea.vmem [#allocation2], %s1106_s22 }
  0x14   : > { %s308_s16 = sshll.u32 %s299_s11, 4  ;;  %p1464_p0 = pnand %p1162_p13, %p1434_p4  ;;  %s309_s16 = int_to_ptr.vmem [resolvable:$true] %s308_s16 }
  0x15   : > { %p1109_p1 = scmp.ge.s32.totalorder %s1339_s10, 1  ;;  %s296_s14 = scalar_lea.sflag [#allocation3], %s295_s21 }
  0x16   : > { %p1233_p2 = pneg %p1464_p0  ;;  %s1244_s13 = scalar_lea.vmem %s309_s16, 1024 }
  0x17   : > { %p1245_p3 = scmp.ne.s32.totalorder %s309_s16, %s1244_s13  ;;  %s1341_s9 = smov [#allocation2]  }
  0x18   : > { %s1249_s24 = sshll.u32 %s1341_s9, 4  ;;  %s1250_s24 = int_to_ptr.vmem [resolvable:$false] %s1249_s24 }
  0x19   : > { %p1247_p5 = pnand %p1245_p3, %p1233_p2  ;;  %s1251_s22 = scalar_lea.vmem %s1250_s24, 2048 }
  0x1a   : > { %p1252_p7 = scmp.lt.s32.totalorder %s309_s16, %s1250_s24  ;;  %p1253_p10 = scmp.lt.s32.totalorder %s1251_s22, %s1244_s13 }
  0x1b   : > { %p1248_p6 = pneg %p1247_p5 }
  0x1c   : > { %p1254_p12 = por %p1253_p10, %p1252_p7 }
  0x1e   : > { %p1255_p4 = pnand %p1254_p12, %p1248_p6 }
  0x20   : > { %1258 = shalt.err (!%p1255_p4)
}
  0x21   : > { %s1342_s15 = smov 256   ;;  %s1343_s21 = smov 16  }
  0x22   : > { %1157 = dma.hbm_to_vmem [thread:$0]  (!%p1464_p0), %s307_s26, 1024, %s309_s16, %s296_s14, %s1342_s15, %s1342_s15, %s1343_s21  }
  0x23   : > { %p316_p13 = scmp.lt.s32.totalorder %s1339_s10, 3 }
  0x25   : > { %p317_p2 = pnand %p1109_p1, %p316_p13 }
  0x26   : > { %s1477_s9 = sand.u32 (!%p317_p2), 1, %s1323_s28  }
  0x27   : > { %320 = sbr.rel (%p317_p2) target bundleno = 522 (0x20a), region = 52  ;;  %s1110_s13 = sshll.u32 (!%p317_p2), %s1477_s9, 6 }
  0x28   : > { %s323_s23 = scalar_lea.sflag (!%p317_p2), [#allocation3], %s1477_s9  ;;  %s326_s25 = scalar_lea.vmem (!%p317_p2), [#allocation2], %s1110_s13 }
  0x2c   : > { %1310 = dma.done.wait (%p1440_p8), %s323_s23, 1024  }
  0x2d   : > { %1312 = vsyncadd (%p1440_p8), %s323_s23, 4294966272  ;;  %v1344_v0 = vmov 0   ;;  %v386_v1 = vld [vmem:[%s326_s25 + $0x28] sm:$0xff]  ;;  %v388_v2 = vld [vmem:[%s326_s25 + $0x38] sm:$0xff]  ;;  %vm469_vm0 = vcmask 261120   ;;  %p369_p8 = scmp.lt.s32.totalorder %s1331_s30, 1 }
  0x2e   : > { %514 = vmatprep.mubr.bf16.mxu0 %v1344_v0  ;;  %534 = vmatprep.mubr.bf16.mxu1 %v1344_v0  ;;  %v385_v3 = vld [vmem:[%s326_s25 + $0x20] sm:$0xff]  ;;  %v400_v4 = vpack.c.bf16 %v388_v2, %v386_v1  ;;  %v387_v5 = vld [vmem:[%s326_s25 + $0x30] sm:$0xff]  ;;  %v382_v6 = vld [vmem:[%s326_s25 + $0x8] sm:$0xff]  ;;  %s1145_s26 = sshll.u32 %s1331_s30, 11  ;;  %s982_s24 = scalar_lea.sflag [#allocation4], %s1477_s9 }
  0x2f   : > { %1217 = vset.pattern.permute.xlu0 %v1344_v0  ;;  %1218 = vset.pattern.permute.xlu1 %v1344_v0  ;;  %v384_v7 = vld [vmem:[%s326_s25 + $0x18] sm:$0xff]  ;;  %v399_v8 = vpack.c.bf16 %v387_v5, %v385_v3  ;;  %v381_v10 = vld [vmem:[%s326_s25] sm:$0xff]  ;;  %v383_v11 = vld [vmem:[%s326_s25 + $0x10] sm:$0xff]  ;;  %s370_s22 = scalar_select %p369_p8, %s1331_s30, 1 }
  0x30   : > { %v398_v9 = vpack.c.bf16 %v384_v7, %v382_v6  ;;  %494 = vmatprep.subr.bf16.mxu0 %v400_v4  ;;  %1146 = vmatprep.subr.bf16.mxu1 %v400_v4  ;;  %v397_v12 = vpack.c.bf16 %v383_v11, %v381_v10  ;;  %v403_v13 = vld [vmem:[%s1739_s3 + $0x10] sm:$0xff]  ;;  %v1219_v14 = vld [vmem:[%s1738_s2] sm:$0xff]   ;;  %v404_v17 = vld [vmem:[%s1739_s3 + $0x18] sm:$0xff]  ;;  %s1111_s25 = sshll.u32 %s1477_s9, 7  ;;  %s1684_s14 = scalar_lea.hbm %s1744_s8, %s1145_s26 }
  0x31   : > { %495 = vmatpush1.bf16.msra.mxu0 %v399_v8  ;;  %1148 = vmatpush1.bf16.msra.mxu1 %v399_v8  ;;  %v1220_v15 = vld [vmem:[%s1738_s2 + $0x10] sm:$0xff]   ;;  %v408_v18 = vld [vmem:[%s1739_s3 + $0x38] sm:$0xff]  ;;  %v1221_v19 = vld [vmem:[%s1738_s2 + $0x8] sm:$0xff]   ;;  %s1144_s15 = sshll.u32 %s370_s22, 7  ;;  %s1641_s17 = scalar_lea.vmem [#allocation5], %s1111_s25 }
  0x32   : > { %496 = vmatprep.subr.bf16.mxu0 %v398_v9  ;;  %1147 = vmatprep.subr.bf16.mxu1 %v398_v9  ;;  %v407_v16 = vld [vmem:[%s1739_s3 + $0x30] sm:$0xff]  ;;  %v1222_v20 = vld [vmem:[%s1738_s2 + $0x18] sm:$0xff]   ;;  %v401_v21 = vld [vmem:[%s1739_s3] sm:$0xff]  ;;  %s1632_s23 = scalar_lea.vmem %s1736_s0, %s1144_s15  ;;  %s997_s11 = sshll.u32 %s1641_s17, 4  ;;  %s1686_s11 = int_to_ptr.vmem [resolvable:$true] %s997_s11 }
  0x33   : > { %421 = vperm.xlu0 %1217, %v403_v13   ;;  %441 = vperm.xlu1 %1218, %v407_v16   ;;  %v402_v22 = vld [vmem:[%s1739_s3 + $0x8] sm:$0xff]  ;;  %v405_v23 = vld [vmem:[%s1739_s3 + $0x20] sm:$0xff]  ;;  %v605_v27 = vld [vmem:[%s1741_s5 + $0x10] sm:$0xff]  ;;  %s1259_s30 = scalar_lea.vmem %s1686_s11, 2048  ;;  %s1345_s22 = smov [#allocation5]  }
  0x34   : > { %v406_v24 = vld [vmem:[%s1739_s3 + $0x28] sm:$0xff]  ;;  %v603_v25 = vld [vmem:[%s1741_s5] sm:$0xff]  ;;  %v606_v28 = vld [vmem:[%s1741_s5 + $0x18] sm:$0xff]  ;;  %p1260_p12 = scmp.ne.s32.totalorder %s1686_s11, %s1259_s30  ;;  %s1263_s15 = sshll.u32 %s1345_s22, 4  ;;  %s1264_s15 = int_to_ptr.vmem [resolvable:$false] %s1263_s15 }
  0x35   : > { %497 = vmatpush1.bf16.msra.mxu0 %v397_v12  ;;  %1149 = vmatpush1.bf16.msra.mxu1 %v397_v12  ;;  %v604_v26 = vld [vmem:[%s1741_s5 + $0x8] sm:$0xff]  ;;  %v607_v29 = vld [vmem:[%s1741_s5 + $0x20] sm:$0xff]  ;;  %v609_v31 = vld [vmem:[%s1741_s5 + $0x30] sm:$0xff]  ;;  %s1265_s21 = scalar_lea.vmem %s1264_s15, 4096  ;;  %p1266_p3 = scmp.lt.s32.totalorder %s1686_s11, %s1264_s15 }
  0x36   : > { %v608_v30 = vld [vmem:[%s1741_s5 + $0x28] sm:$0xff]  ;;  %v610_v32 = vld [vmem:[%s1741_s5 + $0x38] sm:$0xff]  ;;  %v764_v33 = vld [vmem:[%s1743_s7] sm:$0xff]  ;;  %p1261_p0 = pnand %p1260_p12, %p1444_p9  ;;  %p1267_p5 = scmp.lt.s32.totalorder %s1265_s21, %s1259_s30 }
  0x37   : > { %426 = vperm.xlu0 %1217, %v404_v17   ;;  %446 = vperm.xlu1 %1218, %v408_v18   ;;  %v765_v34 = vld [vmem:[%s1743_s7 + $0x8] sm:$0xff]  ;;  %v766_v35 = vld [vmem:[%s1743_s7 + $0x10] sm:$0xff]  ;;  %v767_v36 = vld [vmem:[%s1743_s7 + $0x18] sm:$0xff] }
  0x38   : > { %1118 = vmatmul.mubr.msk.bf16.vlgmr.msra.gmra.mxu0 %vm469_vm0, %v1219_v14  ;;  %1120 = vmatmul.mubr.msk.bf16.vlgmr.msra.gmra.mxu1 %vm469_vm0, %v1220_v15  ;;  %v768_v37 = vld [vmem:[%s1743_s7 + $0x20] sm:$0xff]  ;;  %v769_v38 = vld [vmem:[%s1743_s7 + $0x28] sm:$0xff]  ;;  %v770_v39 = vld [vmem:[%s1743_s7 + $0x30] sm:$0xff]  ;;  %p1262_p1 = pneg %p1261_p0  ;;  %p1268_p6 = por %p1267_p5, %p1266_p3 }
  0x39   : > { %524 = vmatprep.mubr.bf16.mxu0 %v1344_v0  ;;  %544 = vmatprep.mubr.bf16.mxu1 %v1344_v0  ;;  %v771_v40 = vld [vmem:[%s1743_s7 + $0x38] sm:$0xff] }
  0x3a   : > { %p1269_p7 = pnand %p1268_p6, %p1262_p1 }
  0x3b   : > { %411 = vperm.xlu0 %1217, %v401_v21   ;;  %416 = vperm.xlu1 %1218, %v402_v22  }
  0x3f   : > { %431 = vperm.xlu0 %1217, %v405_v23   ;;  %436 = vperm.xlu1 %1218, %v406_v24  }
  0x40   : > { %1119 = vmatmul.mubr.msk.bf16.gmra.mxu0 %vm469_vm0, %v1221_v19  ;;  %1121 = vmatmul.mubr.msk.bf16.gmra.mxu1 %vm469_vm0, %v1222_v20 }
  0x41   : > { %715 = vmatprep.mubr.bf16.mxu1 %v1344_v0  ;;  %876 = vmatprep.mubr.bf16.mxu0 %v1344_v0 }
  0x43   : > { %613 = vperm.xlu0 %1217, %v603_v25   ;;  %618 = vperm.xlu1 %1218, %v604_v26  }
  0x47   : > { %623 = vperm.xlu0 %1217, %v605_v27   ;;  %628 = vperm.xlu1 %1218, %v606_v28  }
  0x4b   : > { %633 = vperm.xlu0 %1217, %v607_v29   ;;  %638 = vperm.xlu1 %1218, %v608_v30  }
  0x4f   : > { %643 = vperm.xlu0 %1217, %v609_v31   ;;  %648 = vperm.xlu1 %1218, %v610_v32  }
  0x53   : > { %774 = vperm.xlu0 %1217, %v764_v33   ;;  %779 = vperm.xlu1 %1218, %v765_v34  }
  0x57   : > { %784 = vperm.xlu0 %1217, %v766_v35   ;;  %789 = vperm.xlu1 %1218, %v767_v36  }
  0x5b   : > { %794 = vperm.xlu0 %1217, %v768_v37   ;;  %799 = vperm.xlu1 %1218, %v769_v38  }
  0x5f   : > { %804 = vperm.xlu0 %1217, %v770_v39   ;;  %809 = vperm.xlu1 %1218, %v771_v40  }
  0xae   : > { %v422_v41 = vpop.permute.xlu0 %421  ;;  %v442_v42 = vpop.permute.xlu1 %441 }
  0xb2   : > { %v427_v43 = vpop.permute.xlu0 %426  ;;  %v447_v44 = vpop.permute.xlu1 %446 }
  0xb6   : > { %v412_v45 = vpop.permute.xlu0 %411  ;;  %v417_v50 = vpop.permute.xlu1 %416 }
  0xba   : > { %v432_v53 = vpop.permute.xlu0 %431  ;;  %v437_v60 = vpop.permute.xlu1 %436 }
  0xf8   : > { %v516_v46 = vpop.f32.mrf.mxu0  ;;  %v536_v47 = vpop.f32.mrf.mxu1 }
  0xf9   : > { %v517_v15 = vadd.f32 %v516_v46, %v412_v45  ;;  %v537_v25 = vadd.f32 %v536_v47, %v432_v53 }
  0xfa   : > { %v518_v48 = vpop.f32.mrf.mxu0  ;;  %v538_v49 = vpop.f32.mrf.mxu1 }
  0xfb   : > { %v519_v56 = vadd.f32 %v518_v48, %v412_v45  ;;  %v539_v57 = vadd.f32 %v538_v49, %v432_v53  ;;  %v555_v40 = vmul.f32 0.1, %v517_v15 }
  0xfc   : > { %v520_v51 = vpop.f32.mrf.mxu0  ;;  %v540_v52 = vpop.f32.mrf.mxu1 }
  0xfd   : > { %v556_v2 = vmul.f32 0.1, %v519_v56  ;;  %v564_v3 = vmul.f32 0.1, %v539_v57  ;;  %v521_v4 = vadd.f32 %v520_v51, %v417_v50  ;;  %v541_v11 = vadd.f32 %v540_v52, %v437_v60 }
  0xfe   : > { %v522_v54 = vpop.f32.mrf.mxu0  ;;  %v542_v55 = vpop.f32.mrf.mxu1 }
  0xff   : > { %v523_v61 = vadd.f32 %v522_v54, %v417_v50  ;;  %v543_v62 = vadd.f32 %v542_v55, %v437_v60  ;;  %v557_v26 = vmul.f32 0.1, %v521_v4  ;;  %v565_v29 = vmul.f32 0.1, %v541_v11  ;;  %v1225_v60 = vld [vmem:[%s1740_s4 + $0x8] sm:$0xff]  }
 0x100   : > { %v526_v58 = vpop.f32.mrf.mxu0  ;;  %v546_v59 = vpop.f32.mrf.mxu1  ;;  %v580_v45 = vmax.f32 %v539_v57, %v564_v3  ;;  %v571_v54 = vmax.f32 %v517_v15, %v555_v40  ;;  %v1224_v57 = vld [vmem:[%s1742_s6] sm:$0xff]  }
 0x101   : > { %v527_v5 = vadd.f32 %v526_v58, %v422_v41  ;;  %v547_v6 = vadd.f32 %v546_v59, %v442_v42  ;;  %v558_v12 = vmul.f32 0.1, %v523_v61  ;;  %v566_v16 = vmul.f32 0.1, %v543_v62  ;;  %v614_v3 = vpop.permute.xlu0 %613 }
 0x102   : > { %v528_v63 = vpop.f32.mrf.mxu0  ;;  %v548_v1 = vpop.f32.mrf.mxu1  ;;  %v573_v48 = vmax.f32 %v521_v4, %v557_v26  ;;  %v581_v49 = vmax.f32 %v541_v11, %v565_v29  ;;  %v917_v11 = vld [vmem:[%s1632_s23] sm:$0xff] }
 0x103   : > { %v529_v7 = vadd.f32 %v528_v63, %v422_v41  ;;  %v549_v8 = vadd.f32 %v548_v1, %v442_v42  ;;  %v559_v27 = vmul.f32 0.1, %v527_v5  ;;  %v567_v28 = vmul.f32 0.1, %v547_v6  ;;  %v1228_v63 = vld [vmem:[%s1742_s6 + $0x10] sm:$0xff]   ;;  %v1229_v1 = vld [vmem:[%s1740_s4 + $0x18] sm:$0xff]   ;;  %v619_v4 = vpop.permute.xlu1 %618 }
 0x104   : > { %v530_v9 = vpop.f32.mrf.mxu0  ;;  %v550_v10 = vpop.f32.mrf.mxu1  ;;  %v574_v32 = vmax.f32 %v523_v61, %v558_v12  ;;  %v582_v33 = vmax.f32 %v543_v62, %v566_v16  ;;  %v563_v41 = vmul.f32 0.1, %v537_v25  ;;  %v587_v58 = vpack.c.bf16 %v573_v48, %v571_v54  ;;  %v1226_v61 = vld [vmem:[%s1742_s6 + $0x8] sm:$0xff]   ;;  %v1227_v62 = vld [vmem:[%s1740_s4 + $0x10] sm:$0xff]  }
 0x105   : > { %v531_v13 = vadd.f32 %v530_v9, %v427_v43  ;;  %v551_v14 = vadd.f32 %v550_v10, %v447_v44  ;;  %v560_v17 = vmul.f32 0.1, %v529_v7  ;;  %v568_v18 = vmul.f32 0.1, %v549_v8  ;;  %v918_v16 = vld [vmem:[%s1632_s23 + $0x8] sm:$0xff] }
 0x106   : > { %v532_v19 = vpop.f32.mrf.mxu0  ;;  %v552_v20 = vpop.f32.mrf.mxu1  ;;  %v575_v42 = vmax.f32 %v527_v5, %v559_v27  ;;  %v592_v53 = vpack.c.bf16 %v582_v33, %v580_v45  ;;  %v579_v55 = vmax.f32 %v537_v25, %v563_v41  ;;  %v922_v45 = vld [vmem:[%s1632_s23 + $0x28] sm:$0xff] }
 0x107   : > { %v561_v21 = vmul.f32 0.1, %v531_v13  ;;  %v569_v22 = vmul.f32 0.1, %v551_v14  ;;  %v533_v23 = vadd.f32 %v532_v19, %v427_v43  ;;  %v553_v24 = vadd.f32 %v552_v20, %v447_v44  ;;  %v624_v5 = vpop.permute.xlu0 %623 }
 0x108   : > { %v576_v36 = vmax.f32 %v529_v7, %v560_v17  ;;  %v584_v37 = vmax.f32 %v549_v8, %v568_v18  ;;  %v583_v43 = vmax.f32 %v547_v6, %v567_v28  ;;  %v572_v44 = vmax.f32 %v519_v56, %v556_v2  ;;  %v1223_v56 = vld [vmem:[%s1740_s4] sm:$0xff]   ;;  %v1230_v2 = vld [vmem:[%s1742_s6 + $0x18] sm:$0xff]   ;;  %v1620_v6 = vpop.permute.xlu1 %628 }
 0x109   : > { %v562_v30 = vmul.f32 0.1, %v533_v23  ;;  %v570_v31 = vmul.f32 0.1, %v553_v24  ;;  %v577_v34 = vmax.f32 %v531_v13, %v561_v21  ;;  %v585_v35 = vmax.f32 %v551_v14, %v569_v22  ;;  %v919_v22 = vld [vmem:[%s1632_s23 + $0x10] sm:$0xff] }
 0x10a   : > { %v588_v52 = vpack.c.bf16 %v574_v32, %v572_v44  ;;  %v591_v59 = vpack.c.bf16 %v581_v49, %v579_v55 }
 0x10b   : > { %v578_v38 = vmax.f32 %v533_v23, %v562_v30  ;;  %v586_v39 = vmax.f32 %v553_v24, %v570_v31  ;;  %v589_v50 = vpack.c.bf16 %v577_v34, %v575_v42  ;;  %v593_v51 = vpack.c.bf16 %v585_v35, %v583_v43  ;;  %v920_v30 = vld [vmem:[%s1632_s23 + $0x18] sm:$0xff] }
 0x10c   : > { %v1625_v7 = vpop.permute.xlu1 %638 }
 0x10d   : > { %v590_v46 = vpack.c.bf16 %v578_v38, %v576_v36  ;;  %v594_v47 = vpack.c.bf16 %v586_v39, %v584_v37  ;;  %v921_v37 = vld [vmem:[%s1632_s23 + $0x20] sm:$0xff] }
 0x10f   : > { %695 = vmatprep.subr.bf16.mxu1 %v590_v46  ;;  %856 = vmatprep.subr.bf16.mxu0 %v594_v47 }
 0x110   : > { %696 = vmatpush1.bf16.msra.mxu1 %v589_v50  ;;  %857 = vmatpush1.bf16.msra.mxu0 %v593_v51  ;;  %v1634_v9 = vpop.permute.xlu1 %648 }
 0x111   : > { %697 = vmatprep.subr.bf16.mxu1 %v588_v52  ;;  %858 = vmatprep.subr.bf16.mxu0 %v592_v53  ;;  %v923_v52 = vld [vmem:[%s1632_s23 + $0x30] sm:$0xff] }
 0x114   : > { %698 = vmatpush1.bf16.msra.mxu1 %v587_v58  ;;  %859 = vmatpush1.bf16.msra.mxu0 %v591_v59  ;;  %v780_v24 = vpop.permute.xlu1 %779 }
 0x117   : > { %1126 = vmatmul.mubr.msk.bf16.vlgmr.msra.gmra.mxu1 %vm469_vm0, %v1223_v56  ;;  %1134 = vmatmul.mubr.msk.bf16.vlgmr.msra.gmra.mxu0 %vm469_vm0, %v1224_v57 }
 0x118   : > { %725 = vmatprep.mubr.bf16.mxu1 %v1344_v0  ;;  %886 = vmatprep.mubr.bf16.mxu0 %v1344_v0  ;;  %v790_v54 = vpop.permute.xlu1 %789 }
 0x11f   : > { %1127 = vmatmul.mubr.msk.bf16.gmra.mxu1 %vm469_vm0, %v1225_v60  ;;  %1135 = vmatmul.mubr.msk.bf16.gmra.mxu0 %vm469_vm0, %v1226_v61  ;;  %v924_v60 = vld [vmem:[%s1632_s23 + $0x38] sm:$0xff] }
 0x120   : > { %735 = vmatprep.mubr.bf16.mxu1 %v1344_v0  ;;  %896 = vmatprep.mubr.bf16.mxu0 %v1344_v0 }
 0x127   : > { %1128 = vmatmul.mubr.msk.bf16.gmra.mxu1 %vm469_vm0, %v1227_v62  ;;  %1136 = vmatmul.mubr.msk.bf16.gmra.mxu0 %vm469_vm0, %v1228_v63 }
 0x128   : > { %745 = vmatprep.mubr.bf16.mxu1 %v1344_v0  ;;  %906 = vmatprep.mubr.bf16.mxu0 %v1344_v0  ;;  %v1622_v0 = vpop.permute.xlu0 %633 }
 0x12c   : > { %v1627_v8 = vpop.permute.xlu0 %643 }
 0x12f   : > { %1129 = vmatmul.mubr.msk.bf16.gmra.mxu1 %vm469_vm0, %v1229_v1  ;;  %1137 = vmatmul.mubr.msk.bf16.gmra.mxu0 %vm469_vm0, %v1230_v2 }
 0x130   : > { %v775_v13 = vpop.permute.xlu0 %774 }
 0x134   : > { %v785_v39 = vpop.permute.xlu0 %784 }
 0x1d7   : > { %v717_v10 = vpop.f32.mrf.mxu1  ;;  %v878_v12 = vpop.f32.mrf.mxu0 }
 0x1d8   : > { %v718_v14 = vadd.f32 %v717_v10, %v614_v3  ;;  %v879_v19 = vadd.f32 %v878_v12, %v775_v13  ;;  %v795_v10 = vpop.permute.xlu0 %794 }
 0x1d9   : > { %v719_v15 = vpop.f32.mrf.mxu1  ;;  %v880_v17 = vpop.f32.mrf.mxu0 }
 0x1da   : > { %v933_v18 = vmul.f32 %v917_v11, %v718_v14  ;;  %v720_v20 = vadd.f32 %v719_v15, %v614_v3  ;;  %v881_v27 = vadd.f32 %v880_v17, %v775_v13 }
 0x1db   : > { %v721_v21 = vpop.f32.mrf.mxu1  ;;  %v882_v23 = vpop.f32.mrf.mxu0 }
 0x1dc   : > { %v949_v25 = vadd.f32 %v933_v18, %v879_v19  ;;  %v934_v26 = vmul.f32 %v918_v16, %v720_v20  ;;  %v722_v28 = vadd.f32 %v721_v21, %v619_v4  ;;  %v883_v34 = vadd.f32 %v882_v23, %v780_v24  ;;  %v926_v16 = vld [vmem:[%s1632_s23 + $0x48] sm:$0xff] }
 0x1dd   : > { %v723_v29 = vpop.f32.mrf.mxu1  ;;  %v884_v31 = vpop.f32.mrf.mxu0 }
 0x1de   : > { %965 = vst [vmem:[%s1641_s17] sm:$0xff] %v949_v25  ;;  %v950_v32 = vadd.f32 %v934_v26, %v881_v27  ;;  %v935_v33 = vmul.f32 %v919_v22, %v722_v28  ;;  %v724_v35 = vadd.f32 %v723_v29, %v619_v4  ;;  %v885_v42 = vadd.f32 %v884_v31, %v780_v24  ;;  %v925_v4 = vld [vmem:[%s1632_s23 + $0x40] sm:$0xff]  ;;  %v927_v22 = vld [vmem:[%s1632_s23 + $0x50] sm:$0xff]  ;;  %v800_v24 = vpop.permute.xlu1 %799 }
 0x1df   : > { %v727_v36 = vpop.f32.mrf.mxu1  ;;  %v888_v38 = vpop.f32.mrf.mxu0 }
 0x1e0   : > { %966 = vst [vmem:[%s1641_s17 + $0x8] sm:$0xff] %v950_v32  ;;  %v951_v40 = vadd.f32 %v935_v33, %v883_v34  ;;  %v936_v41 = vmul.f32 %v920_v30, %v724_v35  ;;  %v728_v43 = vadd.f32 %v727_v36, %v624_v5  ;;  %v889_v49 = vadd.f32 %v888_v38, %v785_v39  ;;  %v928_v30 = vld [vmem:[%s1632_s23 + $0x58] sm:$0xff]  ;;  %v929_v36 = vld [vmem:[%s1632_s23 + $0x60] sm:$0xff]  ;;  %v805_v38 = vpop.permute.xlu0 %804 }
 0x1e1   : > { %v729_v44 = vpop.f32.mrf.mxu1  ;;  %v890_v46 = vpop.f32.mrf.mxu0 }
 0x1e2   : > { %967 = vst [vmem:[%s1641_s17 + $0x10] sm:$0xff] %v951_v40  ;;  %v952_v47 = vadd.f32 %v936_v41, %v885_v42  ;;  %v937_v48 = vmul.f32 %v921_v37, %v728_v43  ;;  %v730_v50 = vadd.f32 %v729_v44, %v624_v5  ;;  %v891_v59 = vadd.f32 %v890_v46, %v785_v39  ;;  %v930_v44 = vld [vmem:[%s1632_s23 + $0x68] sm:$0xff] }
 0x1e3   : > { %v731_v51 = vpop.f32.mrf.mxu1  ;;  %v892_v53 = vpop.f32.mrf.mxu0 }
 0x1e4   : > { %968 = vst [vmem:[%s1641_s17 + $0x18] sm:$0xff] %v952_v47  ;;  %v953_v55 = vadd.f32 %v937_v48, %v889_v49  ;;  %v938_v58 = vmul.f32 %v922_v45, %v730_v50  ;;  %v732_v56 = vadd.f32 %v731_v51, %v1620_v6  ;;  %v893_v1 = vadd.f32 %v892_v53, %v790_v54  ;;  %v931_v50 = vld [vmem:[%s1632_s23 + $0x70] sm:$0xff] }
 0x1e5   : > { %v733_v57 = vpop.f32.mrf.mxu1  ;;  %v894_v61 = vpop.f32.mrf.mxu0 }
 0x1e6   : > { %969 = vst [vmem:[%s1641_s17 + $0x20] sm:$0xff] %v953_v55  ;;  %v954_v62 = vadd.f32 %v938_v58, %v891_v59  ;;  %v939_v63 = vmul.f32 %v923_v52, %v732_v56  ;;  %v734_v2 = vadd.f32 %v733_v57, %v1620_v6  ;;  %v895_v13 = vadd.f32 %v894_v61, %v790_v54  ;;  %v810_v52 = vpop.permute.xlu1 %809  ;;  %v932_v56 = vld [vmem:[%s1632_s23 + $0x78] sm:$0xff] }
 0x1e7   : > { %v737_v3 = vpop.f32.mrf.mxu1  ;;  %v898_v5 = vpop.f32.mrf.mxu0 }
 0x1e8   : > { %970 = vst [vmem:[%s1641_s17 + $0x28] sm:$0xff] %v954_v62  ;;  %v955_v11 = vadd.f32 %v939_v63, %v893_v1  ;;  %v940_v12 = vmul.f32 %v924_v60, %v734_v2  ;;  %v738_v14 = vadd.f32 %v737_v3, %v1622_v0  ;;  %v899_v19 = vadd.f32 %v898_v5, %v795_v10 }
 0x1e9   : > { %v739_v15 = vpop.f32.mrf.mxu1  ;;  %v900_v17 = vpop.f32.mrf.mxu0 }
 0x1ea   : > { %971 = vst [vmem:[%s1641_s17 + $0x30] sm:$0xff] %v955_v11  ;;  %v956_v18 = vadd.f32 %v940_v12, %v895_v13  ;;  %v941_v6 = vmul.f32 %v925_v4, %v738_v14  ;;  %v740_v20 = vadd.f32 %v739_v15, %v1622_v0  ;;  %v901_v27 = vadd.f32 %v900_v17, %v795_v10 }
 0x1eb   : > { %v741_v21 = vpop.f32.mrf.mxu1  ;;  %v902_v23 = vpop.f32.mrf.mxu0 }
 0x1ec   : > { %972 = vst [vmem:[%s1641_s17 + $0x38] sm:$0xff] %v956_v18  ;;  %v957_v25 = vadd.f32 %v941_v6, %v899_v19  ;;  %v942_v26 = vmul.f32 %v926_v16, %v740_v20  ;;  %v742_v28 = vadd.f32 %v741_v21, %v1625_v7  ;;  %v903_v33 = vadd.f32 %v902_v23, %v800_v24 }
 0x1ed   : > { %v743_v29 = vpop.f32.mrf.mxu1  ;;  %v904_v31 = vpop.f32.mrf.mxu0 }
 0x1ee   : > { %973 = vst [vmem:[%s1641_s17 + $0x40] sm:$0xff] %v957_v25  ;;  %v958_v32 = vadd.f32 %v942_v26, %v901_v27  ;;  %v943_v0 = vmul.f32 %v927_v22, %v742_v28  ;;  %v744_v34 = vadd.f32 %v743_v29, %v1625_v7  ;;  %v905_v41 = vadd.f32 %v904_v31, %v800_v24 }
 0x1ef   : > { %v747_v35 = vpop.f32.mrf.mxu1  ;;  %v908_v37 = vpop.f32.mrf.mxu0 }
 0x1f0   : > { %974 = vst [vmem:[%s1641_s17 + $0x48] sm:$0xff] %v958_v32  ;;  %v959_v39 = vadd.f32 %v943_v0, %v903_v33  ;;  %v944_v40 = vmul.f32 %v928_v30, %v744_v34  ;;  %v748_v42 = vadd.f32 %v747_v35, %v1627_v8  ;;  %v909_v47 = vadd.f32 %v908_v37, %v805_v38 }
 0x1f1   : > { %v749_v43 = vpop.f32.mrf.mxu1  ;;  %v910_v45 = vpop.f32.mrf.mxu0 }
 0x1f2   : > { %975 = vst [vmem:[%s1641_s17 + $0x50] sm:$0xff] %v959_v39  ;;  %v960_v46 = vadd.f32 %v944_v40, %v905_v41  ;;  %v945_v7 = vmul.f32 %v929_v36, %v748_v42  ;;  %v750_v48 = vadd.f32 %v749_v43, %v1627_v8  ;;  %v911_v55 = vadd.f32 %v910_v45, %v805_v38 }
 0x1f3   : > { %v751_v49 = vpop.f32.mrf.mxu1  ;;  %v912_v51 = vpop.f32.mrf.mxu0 }
 0x1f4   : > { %976 = vst [vmem:[%s1641_s17 + $0x58] sm:$0xff] %v960_v46  ;;  %v961_v53 = vadd.f32 %v945_v7, %v909_v47  ;;  %v946_v54 = vmul.f32 %v930_v44, %v750_v48  ;;  %v752_v58 = vadd.f32 %v751_v49, %v1634_v9  ;;  %v913_v61 = vadd.f32 %v912_v51, %v810_v52 }
 0x1f5   : > { %v753_v59 = vpop.f32.mrf.mxu1  ;;  %v914_v57 = vpop.f32.mrf.mxu0 }
 0x1f6   : > { %977 = vst [vmem:[%s1641_s17 + $0x60] sm:$0xff] %v961_v53  ;;  %v962_v8 = vadd.f32 %v946_v54, %v911_v55  ;;  %v947_v60 = vmul.f32 %v931_v50, %v752_v58  ;;  %v754_v62 = vadd.f32 %v753_v59, %v1634_v9  ;;  %v915_v2 = vadd.f32 %v914_v57, %v810_v52 }
 0x1f8   : > { %978 = vst [vmem:[%s1641_s17 + $0x68] sm:$0xff] %v962_v8  ;;  %v963_v63 = vadd.f32 %v947_v60, %v913_v61  ;;  %v948_v1 = vmul.f32 %v932_v56, %v754_v62 }
 0x1fa   : > { %979 = vst [vmem:[%s1641_s17 + $0x70] sm:$0xff] %v963_v63  ;;  %v964_v3 = vadd.f32 %v948_v1, %v915_v2 }
 0x1fc   : > { %980 = vst [vmem:[%s1641_s17 + $0x78] sm:$0xff] %v964_v3 }
 0x1fd   : > { %1272 = shalt.err (!%p1269_p7)
}
 0x1fe   : > { %s1273_s13 = scalar_lea.hbm %s1684_s14, 2048  ;;  %s1277_s17 = scalar_lea.hbm %s1744_s8, 4096 }
 0x1ff   : > { %p1274_p10 = scmp.ne.s32.totalorder %s1684_s14, %s1273_s13  ;;  %p1278_p2 = scmp.lt.s32.totalorder %s1684_s14, %s1744_s8 }
 0x200   : > { %p1279_p8 = scmp.lt.s32.totalorder %s1277_s17, %s1273_s13 }
 0x201   : > { %p1275_p4 = pnand %p1274_p10, %p1444_p9 }
 0x202   : > { %p1280_p12 = por %p1279_p8, %p1278_p2 }
 0x203   : > { %p1276_p13 = pneg %p1275_p4 }
 0x205   : > { %p1281_p0 = pnand %p1280_p12, %p1276_p13 }
 0x207   : > { %1284 = shalt.err (!%p1281_p0)
}
 0x208   : > { %s1346_s12 = smov 256   ;;  %s1347_s30 = smov 16  }
 0x209   : > { %1152 = dma.vmem_to_hbm [thread:$0]  (%p1444_p9), %s1686_s11, 2048, %s1684_s14, %s982_s24, %s1346_s12, %s1346_s12, %s1347_s30  }
 0x20a PF: > { %s1012_s22 = sand.u32 1, %s1319_s27   ;;  %p1754_p1 = scmp.ge.s32.totalorder %s1339_s10, 2 }
 0x20b   : > { %s1013_s15 = scalar_lea.sflag [#allocation4], %s1012_s22 }
 0x20c   : > { %p1159_p3 = pnand %p1754_p1, %p1451_p11 }
 0x20e   : > { %p1160_p5 = pneg %p1159_p3 }
 0x210   : > { %1314 = dma.done.wait (%p1160_p5), %s1013_s15, 2048  }
 0x211   : > { %1316 = vsyncadd (%p1160_p5), %s1013_s15, 4294965248  ;;  %s24_s10 = sadd.s32 1, %s1339_s10   ;;  %s1755_s30 = sld [smem:[#allocation8_spill]] }
 0x212   : > { %p21_p6 = scmp.ge.s32.totalorder %s24_s10, 4   ;;  %s1756_s9 = sld [smem:[#allocation9_spill]] }
 0x213   : > { %s1757_s27 = smov %s1323_s28  ;;  %s1758_s28 = smov %s1327_s29 }
 0x214   : > { %s1759_s29 = smov %s1449_s19  ;;  %23 = sbr.rel (!%p21_p6) target bundleno = 6 (0x6), region = 100 }
 0x219   :  { %1018 = vsyncpa [#allocation3], 1 }
 0x21a   :  { %1020 = vsyncpa [#allocation3 + $0x1], 1 }
 0x21b   :  { %1021 = vsyncpa [#allocation4], 1 }
 0x21c   :  { %1023 = vsyncpa [#allocation4 + $0x1], 1 }

</bundles_post_ra>
